<compile_context>
chip_gen: v7x
topology: tpu7x:2x2x1
jax: 0.10.0
libtpu: 0.0.40
codegen_flags: <defaults>
</compile_context>

<pallas_src>
import functools

import jax
import jax.numpy as jnp
import numpy as np
from jax.experimental import pallas as pl
from jax.experimental.pallas import tpu as pltpu

BN_EPS = 1e-5
LANE = 128
_VMEM_BUDGET = 48 * 1024 * 1024   # conservative even for v7x's 64 MiB


def _round_up(x, m):
    return ((x + m - 1) // m) * m


# ------------------------------ fused kernel ------------------------------- #

def _fused_mlp_kernel(x_ref, wfirst_ref, wstk_ref, bias_ref, o_ref,
                      *, num_layers, out_dim):
    """Fused MLPClassifier forward on one batch tile.

    x_ref:      (BB, 2L)  f32   packed [x1 | x2]
    wfirst_ref: (2L, D)   bf16  block-diag first [fc1|fc2] layer (BN folded)
    wstk_ref:   (num_layers+1, D, D) bf16  [stack layers 1.., fc3, fc4]
    bias_ref:   (num_layers+2, D) f32      per-layer folded biases
    o_ref:      (BB, D)   bf16  softmax (real classes in cols [:out_dim])
    Padded columns stay exactly 0 through the ReLU stacks.
    """
    biases = bias_ref[...]                       # (num_layers+2, D) f32, tiny

    # Layer 0 of the fused [fc1 | fc2] stack (block-diagonal, BN folded).
    h = jnp.dot(x_ref[...].astype(jnp.bfloat16), wfirst_ref[...],
                preferred_element_type=jnp.float32)
    h = jnp.maximum(h + biases[0:1, :], 0.0)

    # Remaining fused stack layers (Linear + folded BN + ReLU + Dropout(id)).
    for l in range(1, num_layers):
        h = jnp.dot(h.astype(jnp.bfloat16), wstk_ref[l - 1],
                    preferred_element_type=jnp.float32)
        h = jnp.maximum(h + biases[l:l + 1, :], 0.0)

    # fc3 over the (virtual) concat [h1, h2]: single matmul on the stacked
    # row-halves of W3^T (never materializes a concatenation).
    h = jnp.dot(h.astype(jnp.bfloat16), wstk_ref[num_layers - 1],
                preferred_element_type=jnp.float32)
    h = jnp.maximum(h + biases[num_layers:num_layers + 1, :], 0.0)

    # fc4 (+ Dropout == identity) + Softmax(dim=1) over real columns only.
    logits = jnp.dot(h.astype(jnp.bfloat16), wstk_ref[num_layers],
                     preferred_element_type=jnp.float32)
    logits = logits + biases[num_layers + 1:num_layers + 2, :]
    col = jax.lax.broadcasted_iota(jnp.int32, logits.shape, 1)
    logits = jnp.where(col < out_dim, logits, -1e30)
    m = jnp.max(logits, axis=-1, keepdims=True)
    e = jnp.exp(logits - m)
    denom = jnp.sum(e, axis=-1, keepdims=True)
    o_ref[...] = (e * pl.reciprocal(denom, approx=True)).astype(o_ref.dtype)


# --------------------------- tiling / HW helpers ---------------------------- #

def _tpu_generation():
    """(mxu_tile, num_tensorcores) — 128/1 on v5e, 256/1 on v6e, 256/2 on v7x."""
    try:
        kind = jax.devices()[0].device_kind.lower()
    except Exception:
        kind = ""
    is_v5 = "v5" in kind
    is_v7 = "v7" in kind
    mxu_tile = 128 if is_v5 else 256
    num_tc = 2 if is_v7 else 1
    return mxu_tile, num_tc


def _tile_vmem_bytes(BB, in_width, D, num_layers):
    x_blk = BB * in_width * 4 * 2                      # double-buffered f32 input
    o_blk = BB * D * 2 * 2                             # double-buffered bf16 output
    act = BB * D * 4 * 4                               # live f32 activations/temps
    w = ((num_layers + 1) * D * D + in_width * D) * 2 * 2 \
        + (num_layers + 2) * D * 4 * 2                 # resident (2x-buffered) weights
    return x_blk + o_blk + act + w


def _pick_batch_tile(B, in_width, D, num_layers):
    mxu_tile, num_tc = _tpu_generation()
    B8 = _round_up(max(B, 1), 8)
    if B8 <= mxu_tile:
        return B8
    bb = min(_round_up(B8, mxu_tile), 2048)
    if num_tc >= 2:
        # Keep >= num_tc parallel grid steps so every TensorCore has work.
        bb = min(bb, _round_up((B8 + num_tc - 1) // num_tc, mxu_tile))
    # VMEM guardrail: shrink the tile until the footprint fits the budget.
    while bb > mxu_tile and _tile_vmem_bytes(bb, in_width, D, num_layers) > _VMEM_BUDGET:
        bb -= mxu_tile
    return max(bb, mxu_tile)


# ------------------------------ forward wrapper ----------------------------- #

def mlp_classifier_forward(weights, x1, x2, *, num_layers, output_size, pad_dim):
    B = x1.shape[0]
    x1 = x1.reshape(B, -1).astype(jnp.float32)   # Flatten
    x2 = x2.reshape(B, -1).astype(jnp.float32)   # Flatten
    x = jnp.concatenate([x1, x2], axis=1)        # packed (B, 2L) — not lane-padded
    in_w = x.shape[1]
    D = pad_dim
    assert in_w == weights["w_first"].shape[0], "packed input width must match"

    BB = _pick_batch_tile(B, in_w, D, num_layers)
    B_pad = _round_up(B, BB)
    if B_pad != B:
        x = jnp.pad(x, ((0, B_pad - B), (0, 0)))
    grid = (B_pad // BB,)

    footprint = _tile_vmem_bytes(BB, in_w, D, num_layers)
    vmem_limit = int(min(48 * 1024 * 1024, max(16 * 1024 * 1024, 2 * footprint)))

    n_w = num_layers + 1
    n_b = num_layers + 2
    kernel = functools.partial(_fused_mlp_kernel,
                               num_layers=num_layers, out_dim=output_size)

    out_padded = pl.pallas_call(
        kernel,
        out_shape=jax.ShapeDtypeStruct((B_pad, D), jnp.bfloat16),
        grid=grid,
        in_specs=[
            pl.BlockSpec((BB, in_w), lambda i: (i, 0)),
            pl.BlockSpec((in_w, D), lambda i: (0, 0)),
            pl.BlockSpec((n_w, D, D), lambda i: (0, 0, 0)),
            pl.BlockSpec((n_b, D), lambda i: (0, 0)),
        ],
        out_specs=pl.BlockSpec((BB, D), lambda i: (i, 0)),
        compiler_params=pltpu.CompilerParams(
            dimension_semantics=("parallel",),
            vmem_limit_bytes=vmem_limit),
    )(x, weights["w_first"], weights["w_stack"], weights["biases"])

    return out_padded[:B, :output_size].astype(jnp.float32)


# ----------------------------- parameter setup ------------------------------ #

def prepare_params(params, length, hidden_size, num_layers, output_size):
    """One-time prep: fold eval-mode BN, fuse the two stacks into block-diag
    weights, transpose to (in, out), pad to lane width D, cast weights bf16."""
    assert num_layers >= 1
    L, H, O = length, hidden_size, output_size
    D = _round_up(max(2 * L, H, O), LANE)

    def fold_bn(bn):
        gamma, beta, mean, var = (np.asarray(a, np.float32) for a in bn)
        s = gamma / np.sqrt(var + BN_EPS)
        t = beta - mean * s
        return s, t

    def fold_block(w, b, bn, in_s=None, in_t=None):
        # x @ wt + bf == BN(Linear(x * in_s + in_t)),  w: (out, in), b: (out,)
        w = np.asarray(w, np.float32)
        b = np.asarray(b, np.float32)
        s, t = fold_bn(bn)
        wt = w.T * s[None, :]
        bf = b * s + t
        if in_s is not None:
            bf = bf + in_t @ wt
            wt = in_s[:, None] * wt
        return wt, bf

    biases = np.zeros((num_layers + 2, D), np.float32)

    # --- fused [fc1 | fc2] stack with block-diagonal weights ---
    s1, t1 = fold_bn(params["bn1"])
    s2, t2 = fold_bn(params["bn2"])
    w_first = np.zeros((2 * L, D), np.float32)
    w_rest = np.zeros((max(num_layers - 1, 0), D, D), np.float32)
    for l in range(num_layers):
        (w1, b1), bn1l = params["fc1"][l]
        (w2, b2), bn2l = params["fc2"][l]
        if l == 0:
            wt1, bf1 = fold_block(w1, b1, bn1l, s1, t1)
            wt2, bf2 = fold_block(w2, b2, bn2l, s2, t2)
            w_first[:L, :L] = wt1
            w_first[L:2 * L, L:2 * L] = wt2
        else:
            wt1, bf1 = fold_block(w1, b1, bn1l)
            wt2, bf2 = fold_block(w2, b2, bn2l)
            w_rest[l - 1, :L, :L] = wt1
            w_rest[l - 1, L:2 * L, L:2 * L] = wt2
        biases[l, :L] = bf1
        biases[l, L:2 * L] = bf2

    # --- fc3 (+ its BN), consuming the virtual concat [h1 | h2] ---
    w3, b3 = params["fc3_lin"]
    wt3, bf3 = fold_block(w3, b3, params["fc3_bn"])        # (2L, H), (H,)
    w3_full = np.zeros((D, D), np.float32)
    w3_full[:2 * L, :H] = wt3
    biases[num_layers, :H] = bf3

    # --- fc4 ---
    w4, b4 = params["fc4_lin"]
    w4_full = np.zeros((D, D), np.float32)
    w4_full[:H, :O] = np.asarray(w4, np.float32).T
    biases[num_layers + 1, :O] = np.asarray(b4, np.float32)

    w_stack = np.concatenate([w_rest, w3_full[None], w4_full[None]], axis=0)

    weights = {
        "w_first": jnp.asarray(w_first, jnp.bfloat16),
        "w_stack": jnp.asarray(w_stack, jnp.bfloat16),
        "biases": jnp.asarray(biases, jnp.float32),
    }
    return weights, D


def init_linear(key, out_f, in_f):
    k1, k2 = jax.random.split(key)
    bound = 1.0 / np.sqrt(in_f)
    w = jax.random.uniform(k1, (out_f, in_f), jnp.float32, -bound, bound)
    b = jax.random.uniform(k2, (out_f,), jnp.float32, -bound, bound)
    return w, b


def init_bn(key, dim):
    k1, k2, k3, k4 = jax.random.split(key, 4)
    gamma = 1.0 + 0.1 * jax.random.normal(k1, (dim,), jnp.float32)
    beta = 0.1 * jax.random.normal(k2, (dim,), jnp.float32)
    running_mean = 0.1 * jax.random.normal(k3, (dim,), jnp.float32)
    running_var = 1.0 + 0.1 * jax.random.uniform(k4, (dim,), jnp.float32)
    return gamma, beta, running_mean, running_var


def init_params(key, length, hidden_size, num_layers, output_size):
    keys = iter(jax.random.split(key, 4 * num_layers + 16))
    params = {
        "bn1": init_bn(next(keys), length),
        "bn2": init_bn(next(keys), length),
        "fc1": [(init_linear(next(keys), length, length),
                 init_bn(next(keys), length)) for _ in range(num_layers)],
        "fc2": [(init_linear(next(keys), length, length),
                 init_bn(next(keys), length)) for _ in range(num_layers)],
        "fc3_lin": init_linear(next(keys), hidden_size, 2 * length),
        "fc3_bn": init_bn(next(keys), hidden_size),
        "fc4_lin": init_linear(next(keys), output_size, hidden_size),
    }
    return params


# pure-JAX f32 reference (unfolded params) for verification
def reference_forward(params, x1, x2):
    B = x1.shape[0]
    x1 = x1.reshape(B, -1)
    x2 = x2.reshape(B, -1)

    def bn(x, p):
        gamma, beta, mean, var = p
        s = gamma / jnp.sqrt(var + BN_EPS)
        t = beta - mean * s
        return x * s[None, :] + t[None, :]

    x1 = bn(x1, params["bn1"])
    x2 = bn(x2, params["bn2"])
    for (w, b), p in params["fc1"]:
        x1 = jax.nn.relu(bn(x1 @ w.T + b, p))
    for (w, b), p in params["fc2"]:
        x2 = jax.nn.relu(bn(x2 @ w.T + b, p))
    x = jnp.concatenate([x1, x2], axis=1)
    w3, b3 = params["fc3_lin"]
    x = jax.nn.relu(bn(x @ w3.T + b3, params["fc3_bn"]))
    w4, b4 = params["fc4_lin"]
    return jax.nn.softmax(x @ w4.T + b4, axis=1)


# ----------------------------- main ------------------------------------------ #

if __name__ == "__main__":
    length = 32
    in_ch = 1
    hidden_size = 64
    num_layers = 2
    output_size = 2
    batch = 8

    key = jax.random.PRNGKey(0)
    kp, kx1, kx2 = jax.random.split(key, 3)

    params = init_params(kp, length, hidden_size, num_layers, output_size)
    weights, pad_dim = prepare_params(params, length, hidden_size,
                                      num_layers, output_size)

    # x1/x2: (batch, in_ch, length) — Flatten() -> (batch, in_ch*length) == (batch, length)
    x1 = jax.random.normal(kx1, (batch, in_ch, length), jnp.float32)
    x2 = jax.random.normal(kx2, (batch, in_ch, length), jnp.float32)

    fwd = jax.jit(functools.partial(mlp_classifier_forward,
                                    num_layers=num_layers,
                                    output_size=output_size,
                                    pad_dim=pad_dim))
    out = jax.block_until_ready(fwd(weights, x1, x2))

    ref = jax.block_until_ready(reference_forward(params, x1, x2))
    assert out.shape == (batch, output_size), out.shape
    # bf16 matmul inputs / bf16 output / approx reciprocal -> relaxed tolerance.
    np.testing.assert_allclose(np.asarray(out), np.asarray(ref),
                               rtol=3e-2, atol=3e-2)

    print("KERNEL_OK")
</pallas_src>

<mosaic_0001>
module attributes {stable_mosaic.version = 11 : i64} {
  func.func @_fused_mlp_kernel(%arg0: i32, %arg1: memref<8x64xf32, #tpu.memory_space<vmem>>, %arg2: memref<64x128xbf16, #tpu.memory_space<vmem>>, %arg3: memref<3x128x128xbf16, #tpu.memory_space<vmem>>, %arg4: memref<4x128xf32, #tpu.memory_space<vmem>>, %arg5: memref<8x128xbf16, #tpu.memory_space<vmem>>) attributes {dimension_semantics = [#tpu.dimension_semantics<parallel>], iteration_bounds = array<i64: 1>, scalar_prefetch = 0 : i64, scratch_operands = 0 : i64, tpu.core_type = #tpu.core_type<tc>, window_params = [{transform_indices = @transform_0, window_bounds = array<i64: 8, 64>}, {pipeline_mode = #tpu.pipeline_mode<synchronous>, transform_indices = @transform_1, window_bounds = array<i64: 64, 128>}, {pipeline_mode = #tpu.pipeline_mode<synchronous>, transform_indices = @transform_2, window_bounds = array<i64: 3, 128, 128>}, {pipeline_mode = #tpu.pipeline_mode<synchronous>, transform_indices = @transform_3, window_bounds = array<i64: 4, 128>}, {transform_indices = @transform_4, window_bounds = array<i64: 8, 128>}]} {
    %c0 = arith.constant 0 : index
    %c0_0 = arith.constant 0 : index
    %0 = vector.load %arg4[%c0, %c0_0] : memref<4x128xf32, #tpu.memory_space<vmem>>, vector<4x128xf32>
    %c0_1 = arith.constant 0 : index
    %c0_2 = arith.constant 0 : index
    %1 = vector.load %arg1[%c0_1, %c0_2] : memref<8x64xf32, #tpu.memory_space<vmem>>, vector<8x64xf32>
    %2 = arith.truncf %1 : vector<8x64xf32> to vector<8x64xbf16>
    %c0_3 = arith.constant 0 : index
    %c0_4 = arith.constant 0 : index
    %3 = vector.load %arg2[%c0_3, %c0_4] : memref<64x128xbf16, #tpu.memory_space<vmem>>, vector<64x128xbf16>
    %cst = arith.constant dense<0.000000e+00> : vector<8x128xf32>
    %4 = tpu.matmul %2, %3, %cst {dimension_numbers = #tpu.dot_dimension_numbers<[1], [0], [0], [1], [0, 0, 1, 1], [], []>} : vector<8x64xbf16>, vector<64x128xbf16>, vector<8x128xf32> -> vector<8x128xf32>
    %5 = vector.extract_strided_slice %0 {offsets = [0, 0], sizes = [1, 128], strides = [1, 1]} : vector<4x128xf32> to vector<1x128xf32>
    %6 = vector.broadcast %5 : vector<1x128xf32> to vector<8x128xf32>
    %7 = arith.addf %4, %6 : vector<8x128xf32>
    %cst_5 = arith.constant 0.000000e+00 : f32
    %8 = vector.broadcast %cst_5 : f32 to vector<8x128xf32>
    %9 = arith.maximumf %7, %8 : vector<8x128xf32>
    %10 = arith.truncf %9 : vector<8x128xf32> to vector<8x128xbf16>
    %c0_6 = arith.constant 0 : index
    %c0_7 = arith.constant 0 : index
    %c0_8 = arith.constant 0 : index
    %11 = vector.load %arg3[%c0_6, %c0_7, %c0_8] : memref<3x128x128xbf16, #tpu.memory_space<vmem>>, vector<1x128x128xbf16>
    %12 = vector.shape_cast %11 : vector<1x128x128xbf16> to vector<128x128xbf16>
    %cst_9 = arith.constant dense<0.000000e+00> : vector<8x128xf32>
    %13 = tpu.matmul %10, %12, %cst_9 {dimension_numbers = #tpu.dot_dimension_numbers<[1], [0], [0], [1], [0, 0, 1, 1], [], []>} : vector<8x128xbf16>, vector<128x128xbf16>, vector<8x128xf32> -> vector<8x128xf32>
    %14 = vector.extract_strided_slice %0 {offsets = [1, 0], sizes = [1, 128], strides = [1, 1]} : vector<4x128xf32> to vector<1x128xf32>
    %15 = vector.broadcast %14 : vector<1x128xf32> to vector<8x128xf32>
    %16 = arith.addf %13, %15 : vector<8x128xf32>
    %cst_10 = arith.constant 0.000000e+00 : f32
    %17 = vector.broadcast %cst_10 : f32 to vector<8x128xf32>
    %18 = arith.maximumf %16, %17 : vector<8x128xf32>
    %19 = arith.truncf %18 : vector<8x128xf32> to vector<8x128xbf16>
    %c1 = arith.constant 1 : index
    %c0_11 = arith.constant 0 : index
    %c0_12 = arith.constant 0 : index
    %20 = vector.load %arg3[%c1, %c0_11, %c0_12] : memref<3x128x128xbf16, #tpu.memory_space<vmem>>, vector<1x128x128xbf16>
    %21 = vector.shape_cast %20 : vector<1x128x128xbf16> to vector<128x128xbf16>
    %cst_13 = arith.constant dense<0.000000e+00> : vector<8x128xf32>
    %22 = tpu.matmul %19, %21, %cst_13 {dimension_numbers = #tpu.dot_dimension_numbers<[1], [0], [0], [1], [0, 0, 1, 1], [], []>} : vector<8x128xbf16>, vector<128x128xbf16>, vector<8x128xf32> -> vector<8x128xf32>
    %23 = vector.extract_strided_slice %0 {offsets = [2, 0], sizes = [1, 128], strides = [1, 1]} : vector<4x128xf32> to vector<1x128xf32>
    %24 = vector.broadcast %23 : vector<1x128xf32> to vector<8x128xf32>
    %25 = arith.addf %22, %24 : vector<8x128xf32>
    %cst_14 = arith.constant 0.000000e+00 : f32
    %26 = vector.broadcast %cst_14 : f32 to vector<8x128xf32>
    %27 = arith.maximumf %25, %26 : vector<8x128xf32>
    %28 = arith.truncf %27 : vector<8x128xf32> to vector<8x128xbf16>
    %c2 = arith.constant 2 : index
    %c0_15 = arith.constant 0 : index
    %c0_16 = arith.constant 0 : index
    %29 = vector.load %arg3[%c2, %c0_15, %c0_16] : memref<3x128x128xbf16, #tpu.memory_space<vmem>>, vector<1x128x128xbf16>
    %30 = vector.shape_cast %29 : vector<1x128x128xbf16> to vector<128x128xbf16>
    %cst_17 = arith.constant dense<0.000000e+00> : vector<8x128xf32>
    %31 = tpu.matmul %28, %30, %cst_17 {dimension_numbers = #tpu.dot_dimension_numbers<[1], [0], [0], [1], [0, 0, 1, 1], [], []>} : vector<8x128xbf16>, vector<128x128xbf16>, vector<8x128xf32> -> vector<8x128xf32>
    %32 = vector.extract_strided_slice %0 {offsets = [3, 0], sizes = [1, 128], strides = [1, 1]} : vector<4x128xf32> to vector<1x128xf32>
    %33 = vector.broadcast %32 : vector<1x128xf32> to vector<8x128xf32>
    %34 = arith.addf %31, %33 : vector<8x128xf32>
    %35 = tpu.iota {dimensions = array<i32: 1>} : vector<8x128xi32>
    %c2_i32 = arith.constant 2 : i32
    %36 = vector.broadcast %c2_i32 : i32 to vector<8x128xi32>
    %37 = arith.cmpi slt, %35, %36 : vector<8x128xi32>
    %cst_18 = arith.constant -1.000000e+30 : f32
    %38 = vector.broadcast %cst_18 : f32 to vector<8x128xf32>
    %39 = arith.select %37, %34, %38 : vector<8x128xi1>, vector<8x128xf32>
    %cst_19 = arith.constant dense<0xFF800000> : vector<8xf32>
    %40 = vector.multi_reduction <maximumf>, %39, %cst_19 [1] : vector<8x128xf32> to vector<8xf32>
    %41 = vector.shape_cast %40 : vector<8xf32> to vector<8x1xf32>
    %42 = vector.broadcast %41 : vector<8x1xf32> to vector<8x128xf32>
    %43 = arith.subf %39, %42 : vector<8x128xf32>
    %44 = math.exp %43 : vector<8x128xf32>
    %cst_20 = arith.constant dense<0.000000e+00> : vector<8xf32>
    %45 = vector.multi_reduction <add>, %44, %cst_20 [1] : vector<8x128xf32> to vector<8xf32>
    %46 = vector.shape_cast %45 : vector<8xf32> to vector<8x1xf32>
    %47 = tpu.reciprocal %46 {approx = true} : vector<8x1xf32> -> vector<8x1xf32>
    %48 = vector.broadcast %47 : vector<8x1xf32> to vector<8x128xf32>
    %49 = arith.mulf %44, %48 : vector<8x128xf32>
    %50 = arith.truncf %49 : vector<8x128xf32> to vector<8x128xbf16>
    %c0_21 = arith.constant 0 : index
    %c0_22 = arith.constant 0 : index
    %51 = vector.load %arg5[%c0_21, %c0_22] : memref<8x128xbf16, #tpu.memory_space<vmem>>, vector<8x128xbf16>
    tpu.vector_store %arg5[%c0_21, %c0_22], %50 {strides = array<i32>} : memref<8x128xbf16, #tpu.memory_space<vmem>>, vector<8x128xbf16>,
    return
  }
  func.func @transform_0(%arg0: i32) -> (i32, i32) {
    %c0_i32 = arith.constant 0 : i32
    %c0_i32_0 = arith.constant 0 : i32
    return %arg0, %c0_i32 : i32, i32
  }
  func.func @transform_1(%arg0: i32) -> (i32, i32) {
    %c0_i32 = arith.constant 0 : i32
    %c0_i32_0 = arith.constant 0 : i32
    %c0_i32_1 = arith.constant 0 : i32
    return %c0_i32, %c0_i32_0 : i32, i32
  }
  func.func @transform_2(%arg0: i32) -> (i32, i32, i32) {
    %c0_i32 = arith.constant 0 : i32
    %c0_i32_0 = arith.constant 0 : i32
    %c0_i32_1 = arith.constant 0 : i32
    %c0_i32_2 = arith.constant 0 : i32
    return %c0_i32, %c0_i32_0, %c0_i32_1 : i32, i32, i32
  }
  func.func @transform_3(%arg0: i32) -> (i32, i32) {
    %c0_i32 = arith.constant 0 : i32
    %c0_i32_0 = arith.constant 0 : i32
    %c0_i32_1 = arith.constant 0 : i32
    return %c0_i32, %c0_i32_0 : i32, i32
  }
  func.func @transform_4(%arg0: i32) -> (i32, i32) {
    %c0_i32 = arith.constant 0 : i32
    %c0_i32_0 = arith.constant 0 : i32
    return %arg0, %c0_i32 : i32, i32
  }
}

</mosaic_0001>

<bundles_post_ra>
// kernel: mlp_classifier_forward.1
= control target key start
LH: loop header
LB: loop body
LE: loop exit
PB: predicated region body
PF: predicated region fallthrough
CT: control target
= control target key end

     0   :  { %9 = vsyncpa [#allocation3], 0  ;;  %s814_s0 = inlined_call_operand.vmem [shape: f32[8,64], index: 0, kind: input, shape index: {}]   ;;  %s815_s1 = inlined_call_operand.vmem [shape: bf16[64,128], index: 1, kind: input, shape index: {}]   ;;  %s816_s2 = inlined_call_operand.hbm [shape: bf16[3,128,128], index: 2, kind: input, shape index: {}]   ;;  %s817_s3 = inlined_call_operand.hbm [shape: f32[4,128], index: 3, kind: input, shape index: {}]   ;;  %s818_s4 = inlined_call_operand.vmem [shape: bf16[8,128], index: 4, kind: output, shape index: {}]  }
   0x1   :  { %10 = vsyncpa [#allocation5], 0  ;;  %s699_s15 = smov [#allocation2]   ;;  %s651_s19 = scalar_lea.hbm %s816_s2, 3072 }
   0x2   :  { %s20_s16 = sshll.u32 %s699_s15, 4  ;;  %p652_p0 = scmp.ne.s32.totalorder %s816_s2, %s651_s19  ;;  %s21_s16 = int_to_ptr.vmem [resolvable:$true] %s20_s16 }
   0x3   :  { %p655_p1 = scmp.lt.u32.totalorder %s651_s19, %s816_s2 }
   0x5   :  { %p657_p2 = pnand %p655_p1, %p652_p0 }
   0x7   :  { %660 = shalt.err (!%p657_p2)
}
   0x8   :  { %s661_s24 = scalar_lea.vmem %s21_s16, 3072  ;;  %p666_p4 = scmp.lt.s32.totalorder %s21_s16, %s21_s16 }
   0x9   :  { %p662_p3 = scmp.ne.s32.totalorder %s21_s16, %s661_s24  ;;  %p667_p5 = scmp.lt.s32.totalorder %s661_s24, %s661_s24 }
   0xb   :  { %p668_p6 = por %p667_p5, %p666_p4 }
   0xd   :  { %p669_p7 = pnand %p668_p6, %p662_p3 }
   0xf   :  { %672 = shalt.err (!%p669_p7)
}
  0x10   :  { %s700_s25 = smov 64   ;;  %s701_s26 = smov 4  }
  0x11   :  { %26 = dma.hbm_to_vmem [thread:$0]  %s816_s2, 3072, %s21_s16, [#allocation3], %s700_s25, %s700_s25, %s701_s26  }
  0x12   :  { %s702_s29 = smov [#allocation4]   ;;  %s673_s7 = scalar_lea.hbm %s817_s3, 64 }
  0x13   :  { %s33_s30 = sshll.u32 %s702_s29, 4  ;;  %p674_p8 = scmp.ne.s32.totalorder %s817_s3, %s673_s7  ;;  %s34_s30 = int_to_ptr.vmem [resolvable:$true] %s33_s30 }
  0x14   :  { %p677_p9 = scmp.lt.u32.totalorder %s673_s7, %s817_s3 }
  0x16   :  { %p679_p10 = pnand %p677_p9, %p674_p8 }
  0x18   :  { %682 = shalt.err (!%p679_p10)
}
  0x19   :  { %s683_s12 = scalar_lea.vmem %s34_s30, 64  ;;  %p688_p12 = scmp.lt.s32.totalorder %s34_s30, %s34_s30 }
  0x1a   :  { %p684_p11 = scmp.ne.s32.totalorder %s34_s30, %s683_s12  ;;  %p689_p13 = scmp.lt.s32.totalorder %s683_s12, %s683_s12 }
  0x1c   :  { %p690_p0 = por %p689_p13, %p688_p12 }
  0x1e   :  { %p691_p1 = pnand %p690_p0, %p684_p11 }
  0x20   :  { %694 = shalt.err (!%p691_p1)
}
  0x21   :  { %36 = dma.hbm_to_vmem [thread:$0]  %s817_s3, 64, %s34_s30, [#allocation5]  }
  0x22   :  { %695 = dma.done.wait [#allocation3], 3072  }
  0x23   :  { %696 = vsyncadd [#allocation3], 4294964224 }
  0x24   :  { %697 = dma.done.wait [#allocation5], 64  }
  0x25   :  { %698 = vsyncadd [#allocation5], 4294967232  ;;  %v703_v0 = vmov 0.0   ;;  %vm704_vm0 = vmmov 0   ;;  %v619_v1 = vld [vmem:[%s815_s1] sm:$0xff]   ;;  %v620_v2 = vld [vmem:[%s815_s1 + $0x8] sm:$0xff]   ;;  %v55_v21 = vlaneseq }
  0x26   :  { %541 = vmatprep.subr.bf16.mxu0 %v703_v0  ;;  %549 = vmatprep.mubr.msk.bf16.mxu0 %vm704_vm0, %v703_v0  ;;  %v623_v3 = vld [vmem:[#allocation2] sm:$0xff]   ;;  %v621_v4 = vld [vmem:[%s815_s1 + $0x10] sm:$0xff]   ;;  %v624_v5 = vld [vmem:[#allocation2 + $0x8] sm:$0xff]   ;;  %vm83_vm1 = vcmask 523264  }
  0x27   :  { %553 = vmatprep.subr.bf16.mxu1 %v703_v0  ;;  %569 = vmatprep.mubr.msk.bf16.mxu1 %vm704_vm0, %v703_v0  ;;  %v622_v6 = vld [vmem:[%s815_s1 + $0x18] sm:$0xff]   ;;  %v45_v7 = vld [vmem:[%s814_s0] sm:$0xff]  ;;  %v625_v8 = vld [vmem:[#allocation2 + $0x10] sm:$0xff]   ;;  %v795_v22 = vshrl.u32 %v55_v21, 7  ;;  %v460_v62 = vand.u32 127, %v55_v21 }
  0x28   :  { %542 = vmatpush3.bf16.msra.mxu0 %v619_v1  ;;  %554 = vmatpush3.bf16.msra.mxu1 %v623_v3  ;;  %v46_v9 = vpack.c.bf16 %v45_v7, %v45_v7  ;;  %v626_v10 = vld [vmem:[#allocation2 + $0x18] sm:$0xff]   ;;  %v627_v11 = vld [vmem:[#allocation2 + $0x20] sm:$0xff]   ;;  %v628_v12 = vld [vmem:[#allocation2 + $0x28] sm:$0xff]  }
  0x29   :  { %543 = vmatprep.subr.bf16.mxu0 %v703_v0  ;;  %555 = vmatprep.subr.bf16.mxu1 %v703_v0  ;;  %v629_v13 = vld [vmem:[#allocation2 + $0x30] sm:$0xff]   ;;  %v630_v14 = vld [vmem:[#allocation2 + $0x38] sm:$0xff]   ;;  %v631_v15 = vld [vmem:[#allocation2 + $0x40] sm:$0xff]   ;;  %v57_v23 = vsub.s32 0, %v795_v22  ;;  %v147_v41 = vsub.s32 1, %v795_v22  ;;  %v258_v52 = vsub.s32 2, %v795_v22 }
  0x2a   :  { %v632_v16 = vld [vmem:[#allocation2 + $0x48] sm:$0xff]   ;;  %v633_v17 = vld [vmem:[#allocation2 + $0x50] sm:$0xff]   ;;  %v634_v18 = vld [vmem:[#allocation2 + $0x58] sm:$0xff]   ;;  %v369_v61 = vsub.s32 3, %v795_v22  ;;  %vm461_vm2 = vcmp.lt.s32.totalorder %v460_v62, 2 }
  0x2b   :  { %v635_v19 = vld [vmem:[#allocation2 + $0x60] sm:$0xff]   ;;  %v636_v20 = vld [vmem:[#allocation2 + $0x68] sm:$0xff]   ;;  %v637_v33 = vld [vmem:[#allocation2 + $0x70] sm:$0xff]  }
  0x2c   :  { %544 = vmatpush3.bf16.msra.mxu0 %v620_v2  ;;  %556 = vmatpush3.bf16.msra.mxu1 %v624_v5  ;;  %v44_v24 = vld [vmem:[#allocation4] sm:$0xf]  ;;  %v638_v34 = vld [vmem:[#allocation2 + $0x78] sm:$0xff]   ;;  %v640_v36 = vld [vmem:[#allocation2 + $0x88] sm:$0xff]  }
  0x2d   :  { %545 = vmatprep.subr.bf16.mxu0 %v703_v0  ;;  %557 = vmatprep.subr.bf16.mxu1 %v703_v0  ;;  %v58_v25 = vrot.slane %v44_v24, %v57_v23  ;;  %v639_v35 = vld [vmem:[#allocation2 + $0x80] sm:$0xff]   ;;  %v641_v37 = vld [vmem:[#allocation2 + $0x90] sm:$0xff]   ;;  %v642_v38 = vld [vmem:[#allocation2 + $0x98] sm:$0xff]   ;;  %v148_v42 = vrot.slane %v44_v24, %v147_v41  ;;  %v259_v53 = vrot.slane %v44_v24, %v258_v52 }
  0x2e   :  { %v643_v39 = vld [vmem:[#allocation2 + $0xa0] sm:$0xff]   ;;  %v644_v40 = vld [vmem:[#allocation2 + $0xa8] sm:$0xff]   ;;  %v645_v50 = vld [vmem:[#allocation2 + $0xb0] sm:$0xff]   ;;  %v370_v63 = vrot.slane %v44_v24, %v369_v61 }
  0x2f   :  { %v646_v51 = vld [vmem:[#allocation2 + $0xb8] sm:$0xff]  }
  0x30   :  { %546 = vmatpush3.bf16.msra.mxu0 %v621_v4  ;;  %558 = vmatpush3.bf16.msra.mxu1 %v625_v8 }
  0x31   :  { %547 = vmatprep.subr.bf16.mxu0 %v703_v0  ;;  %559 = vmatprep.subr.bf16.mxu1 %v703_v0 }
  0x34   :  { %548 = vmatpush3.bf16.msra.mxu0 %v622_v6  ;;  %560 = vmatpush3.bf16.msra.mxu1 %v626_v10 }
  0x35   :  { %573 = vmatprep.subr.bf16.mxu0 %v703_v0  ;;  %561 = vmatprep.subr.bf16.mxu1 %v703_v0 }
  0x37   :  { %550 = vmatmul.mubr.msk.bf16.vlgmr.msra.gmra.mrb[0].mxu0 %vm83_vm1, %v46_v9 }
  0x38   :  { %589 = vmatprep.mubr.msk.bf16.mxu0 %vm704_vm0, %v703_v0  ;;  %562 = vmatpush3.bf16.msra.mxu1 %v627_v11 }
  0x39   :  { %563 = vmatprep.subr.bf16.mxu1 %v703_v0  ;;  %574 = vmatpush3.bf16.msra.mxu0 %v631_v15 }
  0x3a   :  { %575 = vmatprep.subr.bf16.mxu0 %v703_v0 }
  0x3c   :  { %564 = vmatpush3.bf16.msra.mxu1 %v628_v12 }
  0x3d   :  { %565 = vmatprep.subr.bf16.mxu1 %v703_v0  ;;  %576 = vmatpush3.bf16.msra.mxu0 %v632_v16 }
  0x3e   :  { %577 = vmatprep.subr.bf16.mxu0 %v703_v0 }
  0x40   :  { %566 = vmatpush3.bf16.msra.mxu1 %v629_v13 }
  0x41   :  { %567 = vmatprep.subr.bf16.mxu1 %v703_v0  ;;  %578 = vmatpush3.bf16.msra.mxu0 %v633_v17 }
  0x42   :  { %579 = vmatprep.subr.bf16.mxu0 %v703_v0 }
  0x44   :  { %568 = vmatpush3.bf16.msra.mxu1 %v630_v14 }
  0x45   :  { %593 = vmatprep.subr.bf16.mxu1 %v703_v0  ;;  %580 = vmatpush3.bf16.msra.mxu0 %v634_v18 }
  0x46   :  { %581 = vmatprep.subr.bf16.mxu0 %v703_v0 }
  0x49   :  { %582 = vmatpush3.bf16.msra.mxu0 %v635_v19 }
  0x4a   :  { %583 = vmatprep.subr.bf16.mxu0 %v703_v0 }
  0x4d   :  { %584 = vmatpush3.bf16.msra.mxu0 %v636_v20 }
  0x4e   :  { %585 = vmatprep.subr.bf16.mxu0 %v703_v0 }
  0x51   :  { %586 = vmatpush3.bf16.msra.mxu0 %v637_v33 }
  0x52   :  { %587 = vmatprep.subr.bf16.mxu0 %v703_v0 }
  0x55   :  { %588 = vmatpush3.bf16.msra.mxu0 %v638_v34 }
 0x10a   :  { %v121_v26 = vpop.f32.mrb[0].mxu0 }
 0x10b   :  { %v122_v27 = vadd.f32 %v121_v26, %v58_v25  ;;  %v551_v28 = vpop.f32.mrb[1].mxu0 }
 0x10c   :  { %v124_v29 = vpop.f32.mrb[2].mxu0 }
 0x10d   :  { %v127_v30 = vmax.f32 %v122_v27, 0.0  ;;  %v552_v31 = vpop.f32.mrb[3].mxu0 }
 0x10f   :  { %v128_v32 = vpack.c.bf16 %v127_v30, %v127_v30 }
 0x111   :  { %570 = vmatmul.mubr.bf16.vlgmr.msra.gmra.mrb[0].mxu1 %v128_v32 }
 0x112   :  { %609 = vmatprep.mubr.msk.bf16.mxu1 %vm704_vm0, %v703_v0  ;;  %594 = vmatpush3.bf16.msra.mxu1 %v639_v35 }
 0x113   :  { %595 = vmatprep.subr.bf16.mxu1 %v703_v0 }
 0x116   :  { %596 = vmatpush3.bf16.msra.mxu1 %v640_v36 }
 0x117   :  { %597 = vmatprep.subr.bf16.mxu1 %v703_v0 }
 0x11a   :  { %598 = vmatpush3.bf16.msra.mxu1 %v641_v37 }
 0x11b   :  { %599 = vmatprep.subr.bf16.mxu1 %v703_v0 }
 0x11e   :  { %600 = vmatpush3.bf16.msra.mxu1 %v642_v38 }
 0x11f   :  { %601 = vmatprep.subr.bf16.mxu1 %v703_v0 }
 0x122   :  { %602 = vmatpush3.bf16.msra.mxu1 %v643_v39 }
 0x123   :  { %603 = vmatprep.subr.bf16.mxu1 %v703_v0 }
 0x126   :  { %604 = vmatpush3.bf16.msra.mxu1 %v644_v40 }
 0x127   :  { %605 = vmatprep.subr.bf16.mxu1 %v703_v0 }
 0x12a   :  { %606 = vmatpush3.bf16.msra.mxu1 %v645_v50 }
 0x12b   :  { %607 = vmatprep.subr.bf16.mxu1 %v703_v0 }
 0x12e   :  { %608 = vmatpush3.bf16.msra.mxu1 %v646_v51 }
 0x1e4   :  { %v231_v43 = vpop.f32.mrb[0].mxu1 }
 0x1e5   :  { %v232_v44 = vadd.f32 %v231_v43, %v148_v42  ;;  %v571_v45 = vpop.f32.mrb[1].mxu1 }
 0x1e6   :  { %v234_v46 = vpop.f32.mrb[2].mxu1 }
 0x1e7   :  { %v237_v47 = vmax.f32 %v232_v44, 0.0  ;;  %v572_v48 = vpop.f32.mrb[3].mxu1 }
 0x1e9   :  { %v238_v49 = vpack.c.bf16 %v237_v47, %v237_v47 }
 0x1eb   :  { %590 = vmatmul.mubr.bf16.vlgmr.msra.gmra.mrb[4].mxu0 %v238_v49 }
 0x2be   :  { %v342_v54 = vpop.f32.mrb[4].mxu0 }
 0x2bf   :  { %v343_v55 = vadd.f32 %v342_v54, %v259_v53  ;;  %v591_v56 = vpop.f32.mrb[5].mxu0 }
 0x2c0   :  { %v345_v57 = vpop.f32.mrb[6].mxu0 }
 0x2c1   :  { %v348_v58 = vmax.f32 %v343_v55, 0.0  ;;  %v592_v59 = vpop.f32.mrb[7].mxu0 }
 0x2c3   :  { %v349_v60 = vpack.c.bf16 %v348_v58, %v348_v58 }
 0x2c5   :  { %610 = vmatmul.mubr.bf16.vlgmr.msra.gmra.mrb[4].mxu1 %v349_v60 }
 0x398   :  { %v453_v1 = vpop.f32.mrb[4].mxu1 }
 0x399   :  { %v454_v0 = vadd.f32 %v453_v1, %v370_v63  ;;  %v611_v2 = vpop.f32.mrb[5].mxu1 }
 0x39a   :  { %v456_v3 = vpop.f32.mrb[6].mxu1 }
 0x39b   :  { %v612_v4 = vpop.f32.mrb[7].mxu1  ;;  %v462_v5 = vsel %vm461_vm2, %v454_v0, -1e+30 }
 0x39c   :  { %463 = vmax.xlane.f32.xlu0 %v462_v5 }
 0x429   :  { %v464_v6 = vpop.xlane.xlu0 %463 }
 0x42a   :  { %v465_v7 = vsub.f32 %v462_v5, %v464_v6 }
 0x42c   :  { %v466_v8 = vmul.f32 1.442695, %v465_v7 }
 0x42e   :  { %647 = vpow2.f32 %v466_v8 }
 0x438   :  { %v648_v9 = vpop.eup %647 }
 0x439   :  { %468 = vadd.xlane.f32.xlu0 %v648_v9 }
 0x4c6   :  { %v469_v10 = vpop.xlane.xlu0 %468 }
 0x4c7   :  { %649 = vrcp.f32 %v469_v10 }
 0x4d1   :  { %v650_v11 = vpop.eup %649 }
 0x4d2   :  { %v471_v12 = vmul.f32 %v650_v11, %v648_v9 }
 0x4d4   :  { %v472_v13 = vpack.c.bf16 %v471_v12, %v471_v12 }
 0x4d6   :  { %473 = vst [vmem:[%s818_s4] sm:$0xf] %v472_v13 }
 0x4d7   :  { %478 = vsyncpa [#allocation3], 1 }
 0x4d8   :  { %479 = vsyncpa [#allocation5], 1 }

</bundles_post_ra>
